<compile_context>
chip_gen: v7x
topology: tpu7x:2x2x1
jax: 0.10.0
libtpu: 0.0.40
codegen_flags: <defaults>
</compile_context>

<pallas_src>
import functools

import jax
import jax.numpy as jnp
from jax.experimental import pallas as pl
from jax.experimental.pallas import tpu as pltpu


def _round_up(x, m):
    return ((x + m - 1) // m) * m


def _choose_tile(batch, block_b):
    """Largest multiple-of-128 tile <= block_b keeping batch-pad waste <~12.5%."""
    bt = min(block_b, _round_up(batch, 128))
    bt = max(128, (bt // 128) * 128)
    while bt > 128:
        b_pad = _round_up(batch, bt)
        if (b_pad - batch) * 8 <= b_pad:          # <= 12.5% padded rows
            break
        bt = max(128, ((bt // 2) // 128) * 128)
    return bt


# ----------------------------- Pallas kernel -------------------------------
def _ranker_kernel(uid_ref, iid_ref, gt_ref, aut_ref, ait_ref, w1gt_ref,
                   b1t_ref, w2t_ref, b2t_ref, w3t_ref, b3_ref, out_ref,
                   *, max_out, min_out, apply_sigmoid):
    bt = out_ref.shape[1]                      # batch tile (lanes)
    u_pad = aut_ref.shape[1]                   # padded #user rows
    i_pad = ait_ref.shape[1]                   # padded #item rows

    uids = uid_ref[...]                        # (1, B_T) int32
    iids = iid_ref[...]                        # (1, B_T) int32

    # --- Fused embedding gather (one-hot matmul on the idle MXU). ----------
    # aut/ait already contain (embedding_table @ w1_slice)^T, so selecting a
    # column IS that id's layer-1 contribution, accumulated in f32.
    u_rows = jax.lax.broadcasted_iota(jnp.int32, (u_pad, bt), 0)
    onehot_u = jnp.where(u_rows == uids, 1.0, 0.0).astype(jnp.bfloat16)
    h1 = jnp.dot(aut_ref[...], onehot_u, preferred_element_type=jnp.float32)

    i_rows = jax.lax.broadcasted_iota(jnp.int32, (i_pad, bt), 0)
    onehot_i = jnp.where(i_rows == iids, 1.0, 0.0).astype(jnp.bfloat16)
    h1 = h1 + jnp.dot(ait_ref[...], onehot_i, preferred_element_type=jnp.float32)

    # Genre contribution: (64, G_PAD) @ (G_PAD, B_T), bf16 in / f32 acc.
    h1 = h1 + jnp.dot(w1gt_ref[...], gt_ref[...],
                      preferred_element_type=jnp.float32)
    h1 = jnp.maximum(h1 + b1t_ref[...], 0.0)                      # ReLU (f32)

    # Layer 2: (32, 64) @ (64, B_T) -> (32, B_T), f32 accumulate.
    h2 = jnp.dot(w2t_ref[...], h1.astype(jnp.bfloat16),
                 preferred_element_type=jnp.float32)
    h2 = jnp.maximum(h2 + b2t_ref[...], 0.0)                      # ReLU (f32)

    # Layer 3 (N=1): VPU multiply + sublane reduce -> lane-dense (1, B_T).
    logits = jnp.sum(h2 * w3t_ref[...], axis=0, keepdims=True) + b3_ref[...]

    if apply_sigmoid:
        out = jax.nn.sigmoid(logits) * (max_out - min_out) + min_out
    else:
        out = logits
    out_ref[...] = out.astype(out_ref.dtype)


def ranker_fused_pallas(uid, iid, gt, aut, ait, w1gt, b1t, w2t, b2t, w3t, b3,
                        max_output_value=5.0, min_output_value=1.0,
                        apply_sigmoid=True, block_b=4096):
    """uid/iid: (1, B_PAD) int32; gt: (G_PAD, B_PAD) bf16.  Returns (1, B_PAD) f32."""
    b_pad = uid.shape[1]
    assert b_pad % block_b == 0, (b_pad, block_b)
    grid = (b_pad // block_b,)

    kernel = functools.partial(
        _ranker_kernel,
        max_out=float(max_output_value),
        min_out=float(min_output_value),
        apply_sigmoid=bool(apply_sigmoid),
    )

    # Resident (non-tiled) operands: full-array block, constant index map.
    const = lambda a: pl.BlockSpec(a.shape, lambda i: tuple(0 for _ in a.shape))
    # Batch-tiled operands: lane axis (last) carries the batch.
    tiled = lambda a: pl.BlockSpec((a.shape[0], block_b), lambda i: (0, i))

    return pl.pallas_call(
        kernel,
        out_shape=jax.ShapeDtypeStruct((1, b_pad), jnp.float32),
        grid=grid,
        in_specs=[
            tiled(uid), tiled(iid), tiled(gt),
            const(aut), const(ait), const(w1gt), const(b1t),
            const(w2t), const(b2t), const(w3t), const(b3),
        ],
        out_specs=pl.BlockSpec((1, block_b), lambda i: (0, i)),  # lane-dense
        compiler_params=pltpu.CompilerParams(
            dimension_semantics=("parallel",),
            vmem_limit_bytes=32 * 1024 * 1024),
    )(uid, iid, gt, aut, ait, w1gt, b1t, w2t, b2t, w3t, b3)


# ----------------------------- Model wrapper --------------------------------
class RankerNNPallas:
    def __init__(self, num_users, num_items, embedding_dim=32, num_genres=19,
                 max_output_value=5, min_output_value=1, key=None):
        if key is None:
            key = jax.random.PRNGKey(0)
        ks = jax.random.split(key, 8)
        d_in = embedding_dim * 2 + num_genres
        self.embedding_dim = embedding_dim
        self.num_genres = num_genres

        # f32 master parameters (shapes match the PyTorch module).
        self.user_embedding = jax.random.normal(
            ks[0], (num_users + 1, embedding_dim), jnp.float32) * 0.1
        self.item_embedding = jax.random.normal(
            ks[1], (num_items + 1, embedding_dim), jnp.float32) * 0.1
        self.w1 = jax.random.normal(ks[2], (d_in, 64), jnp.float32) * 0.1
        self.b1 = jax.random.normal(ks[3], (64,), jnp.float32) * 0.1
        self.w2 = jax.random.normal(ks[4], (64, 32), jnp.float32) * 0.1
        self.b2 = jax.random.normal(ks[5], (32,), jnp.float32) * 0.1
        self.w3 = jax.random.normal(ks[6], (32, 1), jnp.float32) * 0.1
        self.b3 = jax.random.normal(ks[7], (1,), jnp.float32) * 0.1

        # --- Kernel-ready parameters (built ONCE at init). ------------------
        # Fold embedding tables through their slices of w1: gathering an
        # embedding + applying layer 1 becomes a column select of these.
        D = embedding_dim
        U, I = num_users + 1, num_items + 1
        self.u_pad = _round_up(U, 16)
        self.i_pad = _round_up(I, 16)
        self.g_pad = _round_up(num_genres, 16)      # bf16 sublane packing

        w1u = self.w1[:D, :]                        # (D, 64)
        w1i = self.w1[D:2 * D, :]                   # (D, 64)
        w1g = self.w1[2 * D:, :]                    # (G, 64)

        au = self.user_embedding @ w1u              # (U, 64) f32
        ai = self.item_embedding @ w1i              # (I, 64) f32
        self.aut = jnp.pad(au, ((0, self.u_pad - U), (0, 0))
                           ).T.astype(jnp.bfloat16)             # (64, U_PAD)
        self.ait = jnp.pad(ai, ((0, self.i_pad - I), (0, 0))
                           ).T.astype(jnp.bfloat16)             # (64, I_PAD)
        self.w1gt = jnp.pad(w1g, ((0, self.g_pad - num_genres), (0, 0))
                            ).T.astype(jnp.bfloat16)            # (64, G_PAD)
        self.b1t = self.b1.reshape(64, 1)                       # f32
        self.w2t = self.w2.T.astype(jnp.bfloat16)               # (32, 64)
        self.b2t = self.b2.reshape(32, 1)                       # f32
        self.w3t = self.w3                                      # (32, 1) f32
        self.b3k = self.b3.reshape(1, 1)                        # (1, 1) f32

        self.max_output_value = float(max_output_value)
        self.min_output_value = float(min_output_value)
        self.apply_sigmoid_in_forward = True

    def disable_sigmoid_in_forward(self, disable=True):
        # NOTE: toggling recompiles the kernel (apply_sigmoid is baked in).
        self.apply_sigmoid_in_forward = not disable

    def forward(self, user, item, genre, block_b=4096):
        B = user.shape[0]
        bt = _choose_tile(B, block_b)
        b_pad = _round_up(B, bt)

        # Tiny XLA glue: pad ids/genre to the batch tile and lay the batch on
        # the lane axis.  (~60-80 B/sample instead of ~1.1 KB/sample before.)
        uid = jnp.pad(user.astype(jnp.int32), (0, b_pad - B)).reshape(1, b_pad)
        iid = jnp.pad(item.astype(jnp.int32), (0, b_pad - B)).reshape(1, b_pad)
        gt = jnp.pad(genre.astype(jnp.bfloat16),
                     ((0, b_pad - B), (0, self.g_pad - self.num_genres))).T

        out = ranker_fused_pallas(
            uid, iid, gt, self.aut, self.ait, self.w1gt,
            self.b1t, self.w2t, self.b2t, self.w3t, self.b3k,
            max_output_value=self.max_output_value,
            min_output_value=self.min_output_value,
            apply_sigmoid=self.apply_sigmoid_in_forward,
            block_b=bt,
        )
        return out[0, :B]           # (B,) — matches torch .squeeze(); B>=1 -> 1-D


# ------------------------------- Reference ----------------------------------
def _reference_forward(m, user, item, genre):
    ue = jnp.take(m.user_embedding, user, axis=0)
    ie = jnp.take(m.item_embedding, item, axis=0)
    x = jnp.concatenate([ue, ie, genre.astype(jnp.float32)], axis=1)
    h1 = jnp.maximum(x @ m.w1 + m.b1, 0.0)
    h2 = jnp.maximum(h1 @ m.w2 + m.b2, 0.0)
    logits = h2 @ m.w3 + m.b3
    out = jax.nn.sigmoid(logits) * (m.max_output_value - m.min_output_value) \
        + m.min_output_value
    out = jnp.squeeze(out)
    return out[None] if out.ndim == 0 else out


if __name__ == "__main__":
    key = jax.random.PRNGKey(0)
    k_u, k_i, k_g, k_p = jax.random.split(key, 4)

    num_users, num_items = 50, 100
    embedding_dim, num_genres = 32, 19
    batch = 8

    model = RankerNNPallas(num_users, num_items, embedding_dim, num_genres,
                           key=k_p)

    user = jax.random.randint(k_u, (batch,), 0, num_users + 1)
    item = jax.random.randint(k_i, (batch,), 0, num_items + 1)
    genre = (jax.random.uniform(k_g, (batch, num_genres)) > 0.5).astype(
        jnp.float32)

    out = jax.block_until_ready(model.forward(user, item, genre))
    ref = jax.block_until_ready(_reference_forward(model, user, item, genre))

    assert out.shape == (batch,), out.shape
    # bf16 weights / f32 accumulate vs f32 reference -> loose tolerance.
    assert jnp.allclose(out, ref, atol=2e-2, rtol=2e-2), (out, ref)
    print("KERNEL_OK")
</pallas_src>

<mosaic_0001>
module attributes {stable_mosaic.version = 11 : i64} {
  func.func @_ranker_kernel(%arg0: i32, %arg1: memref<1x128xi32, #tpu.memory_space<vmem>>, %arg2: memref<1x128xi32, #tpu.memory_space<vmem>>, %arg3: memref<32x128xbf16, #tpu.memory_space<vmem>>, %arg4: memref<64x64xbf16, #tpu.memory_space<vmem>>, %arg5: memref<64x112xbf16, #tpu.memory_space<vmem>>, %arg6: memref<64x32xbf16, #tpu.memory_space<vmem>>, %arg7: memref<64x1xf32, #tpu.memory_space<vmem>>, %arg8: memref<32x64xbf16, #tpu.memory_space<vmem>>, %arg9: memref<32x1xf32, #tpu.memory_space<vmem>>, %arg10: memref<32x1xf32, #tpu.memory_space<vmem>>, %arg11: memref<1x1xf32, #tpu.memory_space<vmem>>, %arg12: memref<1x128xf32, #tpu.memory_space<vmem>>) attributes {dimension_semantics = [#tpu.dimension_semantics<parallel>], iteration_bounds = array<i64: 1>, scalar_prefetch = 0 : i64, scratch_operands = 0 : i64, tpu.core_type = #tpu.core_type<tc>, window_params = [{transform_indices = @transform_0, window_bounds = array<i64: 1, 128>}, {transform_indices = @transform_1, window_bounds = array<i64: 1, 128>}, {transform_indices = @transform_2, window_bounds = array<i64: 32, 128>}, {pipeline_mode = #tpu.pipeline_mode<synchronous>, transform_indices = @transform_3, window_bounds = array<i64: 64, 64>}, {pipeline_mode = #tpu.pipeline_mode<synchronous>, transform_indices = @transform_4, window_bounds = array<i64: 64, 112>}, {pipeline_mode = #tpu.pipeline_mode<synchronous>, transform_indices = @transform_5, window_bounds = array<i64: 64, 32>}, {pipeline_mode = #tpu.pipeline_mode<synchronous>, transform_indices = @transform_6, window_bounds = array<i64: 64, 1>}, {pipeline_mode = #tpu.pipeline_mode<synchronous>, transform_indices = @transform_7, window_bounds = array<i64: 32, 64>}, {pipeline_mode = #tpu.pipeline_mode<synchronous>, transform_indices = @transform_8, window_bounds = array<i64: 32, 1>}, {pipeline_mode = #tpu.pipeline_mode<synchronous>, transform_indices = @transform_9, window_bounds = array<i64: 32, 1>}, {pipeline_mode = #tpu.pipeline_mode<synchronous>, transform_indices = @transform_10, window_bounds = array<i64: 1, 1>}, {transform_indices = @transform_11, window_bounds = array<i64: 1, 128>}]} {
    %c0 = arith.constant 0 : index
    %c0_0 = arith.constant 0 : index
    %0 = vector.load %arg1[%c0, %c0_0] : memref<1x128xi32, #tpu.memory_space<vmem>>, vector<1x128xi32>
    %c0_1 = arith.constant 0 : index
    %c0_2 = arith.constant 0 : index
    %1 = vector.load %arg2[%c0_1, %c0_2] : memref<1x128xi32, #tpu.memory_space<vmem>>, vector<1x128xi32>
    %2 = tpu.iota {dimensions = array<i32: 0>} : vector<64x128xi32>
    %3 = vector.broadcast %0 : vector<1x128xi32> to vector<64x128xi32>
    %4 = arith.cmpi eq, %2, %3 : vector<64x128xi32>
    %cst = arith.constant 1.000000e+00 : f32
    %cst_3 = arith.constant 0.000000e+00 : f32
    %5 = vector.broadcast %cst : f32 to vector<64x128xf32>
    %6 = vector.broadcast %cst_3 : f32 to vector<64x128xf32>
    %7 = arith.select %4, %5, %6 : vector<64x128xi1>, vector<64x128xf32>
    %8 = arith.truncf %7 : vector<64x128xf32> to vector<64x128xbf16>
    %c0_4 = arith.constant 0 : index
    %c0_5 = arith.constant 0 : index
    %9 = vector.load %arg4[%c0_4, %c0_5] : memref<64x64xbf16, #tpu.memory_space<vmem>>, vector<64x64xbf16>
    %cst_6 = arith.constant dense<0.000000e+00> : vector<64x128xf32>
    %10 = tpu.matmul %9, %8, %cst_6 {dimension_numbers = #tpu.dot_dimension_numbers<[1], [0], [0], [1], [0, 0, 1, 1], [], []>} : vector<64x64xbf16>, vector<64x128xbf16>, vector<64x128xf32> -> vector<64x128xf32>
    %11 = tpu.iota {dimensions = array<i32: 0>} : vector<112x128xi32>
    %12 = vector.broadcast %1 : vector<1x128xi32> to vector<112x128xi32>
    %13 = arith.cmpi eq, %11, %12 : vector<112x128xi32>
    %cst_7 = arith.constant 1.000000e+00 : f32
    %cst_8 = arith.constant 0.000000e+00 : f32
    %14 = vector.broadcast %cst_7 : f32 to vector<112x128xf32>
    %15 = vector.broadcast %cst_8 : f32 to vector<112x128xf32>
    %16 = arith.select %13, %14, %15 : vector<112x128xi1>, vector<112x128xf32>
    %17 = arith.truncf %16 : vector<112x128xf32> to vector<112x128xbf16>
    %c0_9 = arith.constant 0 : index
    %c0_10 = arith.constant 0 : index
    %18 = vector.load %arg5[%c0_9, %c0_10] : memref<64x112xbf16, #tpu.memory_space<vmem>>, vector<64x112xbf16>
    %cst_11 = arith.constant dense<0.000000e+00> : vector<64x128xf32>
    %19 = tpu.matmul %18, %17, %cst_11 {dimension_numbers = #tpu.dot_dimension_numbers<[1], [0], [0], [1], [0, 0, 1, 1], [], []>} : vector<64x112xbf16>, vector<112x128xbf16>, vector<64x128xf32> -> vector<64x128xf32>
    %20 = arith.addf %10, %19 : vector<64x128xf32>
    %c0_12 = arith.constant 0 : index
    %c0_13 = arith.constant 0 : index
    %21 = vector.load %arg6[%c0_12, %c0_13] : memref<64x32xbf16, #tpu.memory_space<vmem>>, vector<64x32xbf16>
    %c0_14 = arith.constant 0 : index
    %c0_15 = arith.constant 0 : index
    %22 = vector.load %arg3[%c0_14, %c0_15] : memref<32x128xbf16, #tpu.memory_space<vmem>>, vector<32x128xbf16>
    %cst_16 = arith.constant dense<0.000000e+00> : vector<64x128xf32>
    %23 = tpu.matmul %21, %22, %cst_16 {dimension_numbers = #tpu.dot_dimension_numbers<[1], [0], [0], [1], [0, 0, 1, 1], [], []>} : vector<64x32xbf16>, vector<32x128xbf16>, vector<64x128xf32> -> vector<64x128xf32>
    %24 = arith.addf %20, %23 : vector<64x128xf32>
    %c0_17 = arith.constant 0 : index
    %c0_18 = arith.constant 0 : index
    %25 = vector.load %arg7[%c0_17, %c0_18] : memref<64x1xf32, #tpu.memory_space<vmem>>, vector<64x1xf32>
    %26 = vector.broadcast %25 : vector<64x1xf32> to vector<64x128xf32>
    %27 = arith.addf %24, %26 : vector<64x128xf32>
    %cst_19 = arith.constant 0.000000e+00 : f32
    %28 = vector.broadcast %cst_19 : f32 to vector<64x128xf32>
    %29 = arith.maximumf %27, %28 : vector<64x128xf32>
    %c0_20 = arith.constant 0 : index
    %c0_21 = arith.constant 0 : index
    %30 = vector.load %arg8[%c0_20, %c0_21] : memref<32x64xbf16, #tpu.memory_space<vmem>>, vector<32x64xbf16>
    %31 = arith.truncf %29 : vector<64x128xf32> to vector<64x128xbf16>
    %cst_22 = arith.constant dense<0.000000e+00> : vector<32x128xf32>
    %32 = tpu.matmul %30, %31, %cst_22 {dimension_numbers = #tpu.dot_dimension_numbers<[1], [0], [0], [1], [0, 0, 1, 1], [], []>} : vector<32x64xbf16>, vector<64x128xbf16>, vector<32x128xf32> -> vector<32x128xf32>
    %c0_23 = arith.constant 0 : index
    %c0_24 = arith.constant 0 : index
    %33 = vector.load %arg9[%c0_23, %c0_24] : memref<32x1xf32, #tpu.memory_space<vmem>>, vector<32x1xf32>
    %34 = vector.broadcast %33 : vector<32x1xf32> to vector<32x128xf32>
    %35 = arith.addf %32, %34 : vector<32x128xf32>
    %cst_25 = arith.constant 0.000000e+00 : f32
    %36 = vector.broadcast %cst_25 : f32 to vector<32x128xf32>
    %37 = arith.maximumf %35, %36 : vector<32x128xf32>
    %c0_26 = arith.constant 0 : index
    %c0_27 = arith.constant 0 : index
    %38 = vector.load %arg10[%c0_26, %c0_27] : memref<32x1xf32, #tpu.memory_space<vmem>>, vector<32x1xf32>
    %39 = vector.broadcast %38 : vector<32x1xf32> to vector<32x128xf32>
    %40 = arith.mulf %37, %39 : vector<32x128xf32>
    %cst_28 = arith.constant dense<0.000000e+00> : vector<128xf32>
    %41 = vector.multi_reduction <add>, %40, %cst_28 [0] : vector<32x128xf32> to vector<128xf32>
    %42 = vector.shape_cast %41 : vector<128xf32> to vector<1x128xf32>
    %c0_29 = arith.constant 0 : index
    %c0_30 = arith.constant 0 : index
    %43 = vector.load %arg11[%c0_29, %c0_30] : memref<1x1xf32, #tpu.memory_space<vmem>>, vector<1x1xf32>
    %44 = vector.broadcast %43 : vector<1x1xf32> to vector<1x128xf32>
    %45 = arith.addf %42, %44 : vector<1x128xf32>
    %46 = arith.negf %45 : vector<1x128xf32>
    %47 = math.exp %46 : vector<1x128xf32>
    %cst_31 = arith.constant 1.000000e+00 : f32
    %48 = vector.broadcast %cst_31 : f32 to vector<1x128xf32>
    %49 = arith.addf %48, %47 : vector<1x128xf32>
    %50 = arith.divf %48, %49 : vector<1x128xf32>
    %cst_32 = arith.constant 4.000000e+00 : f32
    %51 = vector.broadcast %cst_32 : f32 to vector<1x128xf32>
    %52 = arith.mulf %50, %51 : vector<1x128xf32>
    %cst_33 = arith.constant 1.000000e+00 : f32
    %53 = vector.broadcast %cst_33 : f32 to vector<1x128xf32>
    %54 = arith.addf %52, %53 : vector<1x128xf32>
    %c0_34 = arith.constant 0 : index
    %c0_35 = arith.constant 0 : index
    %55 = vector.load %arg12[%c0_34, %c0_35] : memref<1x128xf32, #tpu.memory_space<vmem>>, vector<1x128xf32>
    tpu.vector_store %arg12[%c0_34, %c0_35], %54 {strides = array<i32>} : memref<1x128xf32, #tpu.memory_space<vmem>>, vector<1x128xf32>,
    return
  }
  func.func @transform_0(%arg0: i32) -> (i32, i32) {
    %c0_i32 = arith.constant 0 : i32
    %c0_i32_0 = arith.constant 0 : i32
    return %c0_i32, %arg0 : i32, i32
  }
  func.func @transform_1(%arg0: i32) -> (i32, i32) {
    %c0_i32 = arith.constant 0 : i32
    %c0_i32_0 = arith.constant 0 : i32
    return %c0_i32, %arg0 : i32, i32
  }
  func.func @transform_2(%arg0: i32) -> (i32, i32) {
    %c0_i32 = arith.constant 0 : i32
    %c0_i32_0 = arith.constant 0 : i32
    return %c0_i32, %arg0 : i32, i32
  }
  func.func @transform_3(%arg0: i32) -> (i32, i32) {
    %c0_i32 = arith.constant 0 : i32
    %c0_i32_0 = arith.constant 0 : i32
    %c0_i32_1 = arith.constant 0 : i32
    return %c0_i32, %c0_i32_0 : i32, i32
  }
  func.func @transform_4(%arg0: i32) -> (i32, i32) {
    %c0_i32 = arith.constant 0 : i32
    %c0_i32_0 = arith.constant 0 : i32
    %c0_i32_1 = arith.constant 0 : i32
    return %c0_i32, %c0_i32_0 : i32, i32
  }
  func.func @transform_5(%arg0: i32) -> (i32, i32) {
    %c0_i32 = arith.constant 0 : i32
    %c0_i32_0 = arith.constant 0 : i32
    %c0_i32_1 = arith.constant 0 : i32
    return %c0_i32, %c0_i32_0 : i32, i32
  }
  func.func @transform_6(%arg0: i32) -> (i32, i32) {
    %c0_i32 = arith.constant 0 : i32
    %c0_i32_0 = arith.constant 0 : i32
    %c0_i32_1 = arith.constant 0 : i32
    return %c0_i32, %c0_i32_0 : i32, i32
  }
  func.func @transform_7(%arg0: i32) -> (i32, i32) {
    %c0_i32 = arith.constant 0 : i32
    %c0_i32_0 = arith.constant 0 : i32
    %c0_i32_1 = arith.constant 0 : i32
    return %c0_i32, %c0_i32_0 : i32, i32
  }
  func.func @transform_8(%arg0: i32) -> (i32, i32) {
    %c0_i32 = arith.constant 0 : i32
    %c0_i32_0 = arith.constant 0 : i32
    %c0_i32_1 = arith.constant 0 : i32
    return %c0_i32, %c0_i32_0 : i32, i32
  }
  func.func @transform_9(%arg0: i32) -> (i32, i32) {
    %c0_i32 = arith.constant 0 : i32
    %c0_i32_0 = arith.constant 0 : i32
    %c0_i32_1 = arith.constant 0 : i32
    return %c0_i32, %c0_i32_0 : i32, i32
  }
  func.func @transform_10(%arg0: i32) -> (i32, i32) {
    %c0_i32 = arith.constant 0 : i32
    %c0_i32_0 = arith.constant 0 : i32
    %c0_i32_1 = arith.constant 0 : i32
    return %c0_i32, %c0_i32_0 : i32, i32
  }
  func.func @transform_11(%arg0: i32) -> (i32, i32) {
    %c0_i32 = arith.constant 0 : i32
    %c0_i32_0 = arith.constant 0 : i32
    return %c0_i32, %arg0 : i32, i32
  }
}

</mosaic_0001>

<bundles_post_ra>
// kernel: tpu_custom_call.1
= control target key start
LH: loop header
LB: loop body
LE: loop exit
PB: predicated region body
PF: predicated region fallthrough
CT: control target
= control target key end

     0   :  { %s1224_s0 = inlined_call_operand.vmem [shape: s32[1,128], index: 0, kind: input, shape index: {}]   ;;  %s1225_s1 = inlined_call_operand.vmem [shape: s32[1,128], index: 1, kind: input, shape index: {}]   ;;  %s1226_s2 = inlined_call_operand.vmem [shape: bf16[32,128], index: 2, kind: input, shape index: {}]   ;;  %s1227_s3 = inlined_call_operand.vmem [shape: bf16[64,64], index: 3, kind: input, shape index: {}]   ;;  %s1228_s4 = inlined_call_operand.vmem [shape: bf16[64,112], index: 4, kind: input, shape index: {}]   ;;  %s1229_s5 = inlined_call_operand.vmem [shape: bf16[64,32], index: 5, kind: input, shape index: {}]   ;;  %s1230_s6 = inlined_call_operand.vmem [shape: f32[64,1], index: 6, kind: input, shape index: {}]   ;;  %s1231_s7 = inlined_call_operand.vmem [shape: bf16[32,64], index: 7, kind: input, shape index: {}]   ;;  %s1232_s8 = inlined_call_operand.vmem [shape: f32[32,1], index: 8, kind: input, shape index: {}]   ;;  %s1233_s9 = inlined_call_operand.vmem [shape: f32[32,1], index: 9, kind: input, shape index: {}]   ;;  %s1234_s10 = inlined_call_operand.<no memory space> [shape: f32[1,1], index: 10, kind: input, shape index: {}]   ;;  %s1235_s11 = inlined_call_operand.hbm [shape: f32[1,128], index: 11, kind: output, shape index: {}]  }
   0x1   :  { %v16_v0 = vstv %s1234_s10 }
   0x2   :  { %17 = vst [vmem:[#allocation2] sm:$0x1] %v16_v0 }
   0x3   :  { %v700_v1 = vld [vmem:[%s1224_s0] ss:$0 sm:$0xff]  ;;  %v44_v2 = vlaneseq  ;;  %vm256_vm0 = vcmask 523264   ;;  %vm158_vm10 = vcmask 916480   ;;  %v913_v11 = vmov 1.0|1.0  }
   0x4   :  { %v985_v3 = vld [vmem:[%s1225_s1] ss:$0 sm:$0xff]  ;;  %v914_v19 = vmov 0   ;;  %v870_v26 = vld [vmem:[%s1227_s3 + $0x8] sm:$0xff]   ;;  %v466_v28 = vld [vmem:[%s1230_s6 + $0x10] sm:$0xff] }
   0x5   :  { %v869_v4 = vld [vmem:[%s1227_s3] sm:$0xff]   ;;  %v990_v5 = vshrl.u32 %v44_v2, 7  ;;  %867 = vset.pattern.permute.xlu0 %v914_v19  ;;  %868 = vset.pattern.permute.xlu1 %v914_v19  ;;  %v872_v29 = vld [vmem:[%s1227_s3 + $0x10] sm:$0xff]   ;;  %v465_v32 = vld [vmem:[%s1230_s6 + $0x8] sm:$0xff] }
   0x6   :  { %816 = vmatprep.mubr.msk.bf16.mxu0 %vm256_vm0, %v869_v4  ;;  %v875_v14 = vld [vmem:[%s1228_s4] sm:$0xff]   ;;  %484 = vperm.xlu1 %868, %v466_v28   ;;  %v874_v33 = vld [vmem:[%s1226_s2 + $0x8] sm:$0xff]   ;;  %v467_v36 = vld [vmem:[%s1230_s6 + $0x18] sm:$0xff] }
   0x7   :  { %v46_v6 = vadd.s32 8, %v990_v5  ;;  %vm57_vm1 = vcmp.eq.s32.totalorder %v990_v5, %v700_v1  ;;  %v47_v7 = vadd.s32 16, %v990_v5  ;;  %vm95_vm2 = vcmp.eq.s32.totalorder %v990_v5, %v985_v3  ;;  %800 = vmatprep.mubr.msk.bf16.mxu1 %vm158_vm10, %v875_v14  ;;  %v871_v24 = vld [vmem:[%s1226_s2] sm:$0xff]  }
   0x8   :  { %v48_v8 = vadd.s32 24, %v990_v5  ;;  %v49_v9 = vadd.s32 32, %v990_v5  ;;  %v50_v10 = vadd.s32 40, %v990_v5  ;;  %v51_v12 = vadd.s32 48, %v990_v5  ;;  %v464_v25 = vld [vmem:[%s1230_s6] sm:$0xff] }
   0x9   :  { %vm58_vm3 = vcmp.eq.s32.totalorder %v46_v6, %v700_v1  ;;  %vm96_vm4 = vcmp.eq.s32.totalorder %v46_v6, %v985_v3  ;;  %vm59_vm5 = vcmp.eq.s32.totalorder %v47_v7, %v700_v1  ;;  %vm97_vm8 = vcmp.eq.s32.totalorder %v47_v7, %v985_v3  ;;  %474 = vperm.xlu0 %867, %v464_v25   ;;  %v468_v35 = vld [vmem:[%s1230_s6 + $0x20] sm:$0xff] }
   0xa   :  { %vm728_vm6 = vmpackc.low %vm58_vm3, %vm57_vm1  ;;  %vm60_vm7 = vcmp.eq.s32.totalorder %v48_v8, %v700_v1  ;;  %vm98_vm9 = vcmp.eq.s32.totalorder %v48_v8, %v985_v3  ;;  %vm61_vm12 = vcmp.eq.s32.totalorder %v49_v9, %v700_v1  ;;  %vm62_vm13 = vcmp.eq.s32.totalorder %v50_v10, %v700_v1 }
   0xb   :  { %808 = vmatprep.subr.msk.bf16.mxu0 %vm728_vm6, %v913_v11  ;;  %vm706_vm11 = vmpackc.low %vm96_vm4, %vm95_vm2  ;;  %v52_v13 = vadd.s32 56, %v990_v5  ;;  %vm99_vm15 = vcmp.eq.s32.totalorder %v49_v9, %v985_v3  ;;  %vm100_vm1 = vcmp.eq.s32.totalorder %v50_v10, %v985_v3  ;;  %v85_v17 = vadd.s32 64, %v990_v5 }
   0xc   :  { %786 = vmatprep.subr.msk.bf16.mxu1 %vm706_vm11, %v913_v11  ;;  %809 = vmatpush3.bf16.msk.msra.mxu0 %vm728_vm6, %v913_v11  ;;  %vm730_vm14 = vmpackc.low %vm60_vm7, %vm59_vm5  ;;  %vm63_vm5 = vcmp.eq.s32.totalorder %v51_v12, %v700_v1  ;;  %vm101_vm7 = vcmp.eq.s32.totalorder %v51_v12, %v985_v3  ;;  %v86_v18 = vadd.s32 72, %v990_v5  ;;  %v87_v22 = vadd.s32 80, %v990_v5 }
   0xd   :  { %787 = vmatpush3.bf16.msk.msra.mxu1 %vm706_vm11, %v913_v11  ;;  %810 = vmatprep.subr.msk.bf16.mxu0 %vm730_vm14, %v913_v11  ;;  %vm708_vm2 = vmpackc.low %vm98_vm9, %vm97_vm8  ;;  %vm64_vm6 = vcmp.eq.s32.totalorder %v52_v13, %v700_v1  ;;  %vm102_vm8 = vcmp.eq.s32.totalorder %v52_v13, %v985_v3  ;;  %v88_v23 = vadd.s32 88, %v990_v5  ;;  %v89_v30 = vadd.s32 96, %v990_v5 }
   0xe   :  { %788 = vmatprep.subr.msk.bf16.mxu1 %vm708_vm2, %v913_v11  ;;  %vm1022_vm3 = vmpackc.low %vm62_vm13, %vm61_vm12  ;;  %vm103_vm12 = vcmp.eq.s32.totalorder %v85_v17, %v985_v3  ;;  %vm104_vm13 = vcmp.eq.s32.totalorder %v86_v18, %v985_v3  ;;  %v90_v31 = vadd.s32 104, %v990_v5  ;;  %479 = vperm.xlu0 %867, %v465_v32  }
   0xf   :  { %vm1027_vm4 = vmpackc.low %vm100_vm1, %vm99_vm15  ;;  %vm105_vm15 = vcmp.eq.s32.totalorder %v87_v22, %v985_v3  ;;  %vm106_vm1 = vcmp.eq.s32.totalorder %v88_v23, %v985_v3 }
  0x10   :  { %811 = vmatpush3.bf16.msk.msra.mxu0 %vm730_vm14, %v913_v11  ;;  %vm1043_vm9 = vmpackc.low %vm64_vm6, %vm63_vm5 }
  0x11   :  { %789 = vmatpush3.bf16.msk.msra.mxu1 %vm708_vm2, %v913_v11  ;;  %812 = vmatprep.subr.msk.bf16.mxu0 %vm1022_vm3, %v913_v11  ;;  %vm1047_vm11 = vmpackc.low %vm102_vm8, %vm101_vm7 }
  0x12   :  { %790 = vmatprep.subr.msk.bf16.mxu1 %vm1027_vm4, %v913_v11  ;;  %vm1076_vm14 = vmpackc.low %vm104_vm13, %vm103_vm12 }
  0x13   :  { %vm1106_vm2 = vmpackc.low %vm106_vm1, %vm105_vm15 }
  0x14   :  { %813 = vmatpush3.bf16.msk.msra.mxu0 %vm1022_vm3, %v913_v11  ;;  %vm107_vm3 = vcmp.eq.s32.totalorder %v89_v30, %v985_v3 }
  0x15   :  { %791 = vmatpush3.bf16.msk.msra.mxu1 %vm1027_vm4, %v913_v11  ;;  %814 = vmatprep.subr.msk.bf16.mxu0 %vm1043_vm9, %v913_v11  ;;  %vm108_vm4 = vcmp.eq.s32.totalorder %v90_v31, %v985_v3 }
  0x16   :  { %792 = vmatprep.subr.msk.bf16.mxu1 %vm1047_vm11, %v913_v11 }
  0x18   :  { %815 = vmatpush3.bf16.msk.msra.mxu0 %vm1043_vm9, %v913_v11 }
  0x19   :  { %793 = vmatpush3.bf16.msk.msra.mxu1 %vm1047_vm11, %v913_v11  ;;  %824 = vmatprep.subr.bf16.mxu0 %v871_v24 }
  0x1a   :  { %794 = vmatprep.subr.msk.bf16.mxu1 %vm1076_vm14, %v913_v11 }
  0x1b   :  { %817 = vmatmul.mubr.msk.bf16.vlgmr.msra.gmra.mrb[0].mxu0 %vm256_vm0, %v870_v26 }
  0x1c   :  { %825 = vmatpush3.bf16.msra.mxu0 %v871_v24  ;;  %820 = vmatprep.mubr.msk.bf16.mxu0 %vm256_vm0, %v872_v29 }
  0x1d   :  { %795 = vmatpush3.bf16.msk.msra.mxu1 %vm1076_vm14, %v913_v11  ;;  %826 = vmatprep.subr.bf16.mxu0 %v874_v33 }
  0x1e   :  { %18 = vsyncpa [#allocation4], 0  ;;  %796 = vmatprep.subr.msk.bf16.mxu1 %vm1106_vm2, %v913_v11  ;;  %489 = vperm.xlu1 %868, %v467_v36   ;;  %v873_v37 = vld [vmem:[%s1227_s3 + $0x18] sm:$0xff]   ;;  %v469_v39 = vld [vmem:[%s1230_s6 + $0x28] sm:$0xff]  ;;  %vm378_vm6 = vcmask 261120  }
  0x1f   :  { %vm1128_vm5 = vmpackc.low %vm108_vm4, %vm107_vm3  ;;  %494 = vperm.xlu0 %867, %v468_v35   ;;  %v877_v40 = vld [vmem:[%s1229_s5] sm:$0xff]   ;;  %v470_v41 = vld [vmem:[%s1230_s6 + $0x30] sm:$0xff] }
  0x20   :  { %827 = vmatpush3.bf16.msra.mxu0 %v874_v33  ;;  %v471_v42 = vld [vmem:[%s1230_s6 + $0x38] sm:$0xff]  ;;  %v876_v43 = vld [vmem:[%s1228_s4 + $0x8] sm:$0xff]   ;;  %v536_v44 = vld [vmem:[%s1232_s8] sm:$0xff] }
  0x21   :  { %797 = vmatpush3.bf16.msk.msra.mxu1 %vm1106_vm2, %v913_v11  ;;  %v879_v45 = vld [vmem:[%s1228_s4 + $0x10] sm:$0xff]   ;;  %v878_v46 = vld [vmem:[%s1229_s5 + $0x8] sm:$0xff]   ;;  %v539_v50 = vld [vmem:[%s1232_s8 + $0x18] sm:$0xff] }
  0x22   :  { %798 = vmatprep.subr.msk.bf16.mxu1 %vm1128_vm5, %v913_v11  ;;  %499 = vperm.xlu1 %868, %v469_v39   ;;  %v537_v47 = vld [vmem:[%s1232_s8 + $0x8] sm:$0xff]  ;;  %v881_v48 = vld [vmem:[%s1229_s5 + $0x10] sm:$0xff]   ;;  %v880_v51 = vld [vmem:[%s1228_s4 + $0x18] sm:$0xff]  }
  0x23   :  { %821 = vmatmul.mubr.msk.bf16.gmra.mrb[4].mxu0 %vm256_vm0, %v873_v37  ;;  %504 = vperm.xlu0 %867, %v470_v41   ;;  %v538_v49 = vld [vmem:[%s1232_s8 + $0x10] sm:$0xff]  ;;  %v629_v52 = vld [vmem:[%s1233_s9] sm:$0xff]  ;;  %v882_v53 = vld [vmem:[%s1229_s5 + $0x18] sm:$0xff]  }
  0x24   :  { %828 = vmatprep.mubr.msk.bf16.mxu0 %vm378_vm6, %v877_v40  ;;  %v630_v54 = vld [vmem:[%s1233_s9 + $0x8] sm:$0xff]  ;;  %v631_v55 = vld [vmem:[%s1233_s9 + $0x10] sm:$0xff]  ;;  %v632_v56 = vld [vmem:[%s1233_s9 + $0x18] sm:$0xff] }
  0x25   :  { %799 = vmatpush3.bf16.msk.msra.mxu1 %vm1128_vm5, %v913_v11  ;;  %v666_v57 = vld [vmem:[#allocation2] sm:$0x1] }
  0x26   :  { %509 = vperm.xlu1 %868, %v471_v42   ;;  %v883_v58 = vld [vmem:[%s1231_s7] sm:$0xff]  }
  0x27   :  { %542 = vperm.xlu0 %867, %v536_v44  }
  0x28   :  { %801 = vmatmul.mubr.msk.bf16.vlgmr.msra.gmra.mrb[0].mxu1 %vm158_vm10, %v876_v43 }
  0x29   :  { %804 = vmatprep.mubr.msk.bf16.mxu1 %vm158_vm10, %v879_v45 }
  0x2a   :  { %547 = vperm.xlu1 %868, %v537_v47  }
  0x2b   :  { %829 = vmatmul.mubr.msk.bf16.vlgmr.msra.gmra.mrb[0].mxu0 %vm378_vm6, %v878_v46  ;;  %552 = vperm.xlu0 %867, %v538_v49  }
  0x2c   :  { %832 = vmatprep.mubr.msk.bf16.mxu0 %vm378_vm6, %v881_v48  ;;  %v884_v48 = vld [vmem:[%s1231_s7 + $0x8] sm:$0xff]   ;;  %s915_s7 = smov [#allocation3]  }
  0x2d   :  { %s692_s12 = sshll.u32 %s915_s7, 4  ;;  %s693_s12 = int_to_ptr.vmem [resolvable:$true] %s692_s12 }
  0x2e   :  { %557 = vperm.xlu1 %868, %v539_v50   ;;  %s889_s13 = scalar_lea.vmem %s693_s12, 16  ;;  %s893_s14 = scalar_lea.vmem %s693_s12, 32 }
  0x2f   :  { %635 = vperm.xlu0 %867, %v629_v52   ;;  %p890_p0 = scmp.ne.s32.totalorder %s693_s12, %s889_s13  ;;  %p894_p1 = scmp.lt.s32.totalorder %s693_s12, %s693_s12 }
  0x30   :  { %805 = vmatmul.mubr.msk.bf16.gmra.mrb[4].mxu1 %vm158_vm10, %v880_v51  ;;  %p895_p2 = scmp.lt.s32.totalorder %s893_s14, %s889_s13 }
  0x31   :  { %844 = vmatprep.mubr.msk.bf16.mxu1 %vm256_vm0, %v883_v58 }
  0x32   :  { %640 = vperm.xlu1 %868, %v630_v54   ;;  %p896_p3 = por %p895_p2, %p894_p1 }
  0x33   :  { %833 = vmatmul.mubr.msk.bf16.gmra.mrb[4].mxu0 %vm378_vm6, %v882_v53  ;;  %645 = vperm.xlu0 %867, %v631_v55  }
  0x34   :  { %p897_p4 = pnand %p896_p3, %p890_p0 }
  0x36   :  { %650 = vperm.xlu1 %868, %v632_v56  }
  0x37   :  { %669 = vperm.xlu0 %867, %v666_v57  }
  0x85   :  { %v485_v60 = vpop.permute.xlu1 %484 }
  0x88   :  { %v475_v59 = vpop.permute.xlu0 %474 }
  0x8d   :  { %v480_v62 = vpop.permute.xlu0 %479 }
  0x9d   :  { %v490_v0 = vpop.permute.xlu1 %489 }
  0x9e   :  { %v495_v12 = vpop.permute.xlu0 %494 }
  0xa1   :  { %v500_v17 = vpop.permute.xlu1 %499 }
  0xa2   :  { %v505_v30 = vpop.permute.xlu0 %504 }
  0xa5   :  { %v510_v37 = vpop.permute.xlu1 %509 }
  0xa6   :  { %v543_v49 = vpop.permute.xlu0 %542 }
  0xa9   :  { %v548_v50 = vpop.permute.xlu1 %547 }
  0xaa   :  { %v553_v51 = vpop.permute.xlu0 %552 }
  0xad   :  { %v558_v52 = vpop.permute.xlu1 %557 }
  0xae   :  { %v636_v58 = vpop.permute.xlu0 %635 }
  0xfb   :  { %v802_v61 = vpop.f32.mrb[0].mxu1 }
  0xfc   :  { %v205_v63 = vpop.f32.mrb[1].mxu1 }
  0xfd   :  { %v803_v1 = vpop.f32.mrb[2].mxu1 }
  0xfe   :  { %v208_v2 = vpop.f32.mrb[3].mxu1  ;;  %v830_v3 = vpop.f32.mrb[0].mxu0 }
  0xff   :  { %v848_v4 = vadd.f32 %v830_v3, %v802_v61  ;;  %v425_v6 = vpop.f32.mrb[1].mxu0 }
 0x100   :  { %v849_v7 = vadd.f32 %v425_v6, %v205_v63  ;;  %v831_v8 = vpop.f32.mrb[2].mxu0  ;;  %v641_v63 = vpop.permute.xlu1 %640 }
 0x101   :  { %v514_v9 = vadd.f32 %v848_v4, %v485_v60  ;;  %v850_v10 = vadd.f32 %v831_v8, %v803_v1  ;;  %v428_v11 = vpop.f32.mrb[3].mxu0  ;;  %v646_v6 = vpop.permute.xlu0 %645 }
 0x102   :  { %v512_v13 = vadd.f32 %v849_v7, %v475_v59  ;;  %v851_v14 = vadd.f32 %v428_v11, %v208_v2 }
 0x103   :  { %v515_v15 = vadd.f32 %v850_v10, %v490_v0  ;;  %v806_v16 = vpop.f32.mrb[4].mxu1  ;;  %v522_v20 = vmax.f32 %v514_v9, 0.0 }
 0x104   :  { %v513_v18 = vadd.f32 %v851_v14, %v480_v62  ;;  %v221_v19 = vpop.f32.mrb[5].mxu1  ;;  %v520_v23 = vmax.f32 %v512_v13, 0.0  ;;  %v651_v9 = vpop.permute.xlu1 %650 }
 0x105   :  { %v523_v21 = vmax.f32 %v515_v15, 0.0  ;;  %v807_v22 = vpop.f32.mrb[6].mxu1 }
 0x106   :  { %v521_v24 = vmax.f32 %v513_v18, 0.0  ;;  %v224_v25 = vpop.f32.mrb[7].mxu1  ;;  %v834_v26 = vpop.f32.mrb[4].mxu0 }
 0x107   :  { %v852_v27 = vadd.f32 %v834_v26, %v806_v16  ;;  %v441_v28 = vpop.f32.mrb[5].mxu0  ;;  %v533_v29 = vpack.c.bf16 %v523_v21, %v522_v20  ;;  %v674_v16 = vsub.s32 0, %v990_v5  ;;  %v670_v18 = vpop.permute.xlu0 %669 }
 0x108   :  { %v853_v31 = vadd.f32 %v441_v28, %v221_v19  ;;  %v835_v32 = vpop.f32.mrb[6].mxu0  ;;  %v532_v33 = vpack.c.bf16 %v521_v24, %v520_v23 }
 0x109   :  { %v518_v34 = vadd.f32 %v852_v27, %v505_v30  ;;  %v854_v35 = vadd.f32 %v835_v32, %v807_v22  ;;  %v444_v36 = vpop.f32.mrb[7].mxu0  ;;  %v675_v20 = vrot.slane %v670_v18, %v674_v16 }
 0x10a   :  { %v516_v38 = vadd.f32 %v853_v31, %v495_v12  ;;  %v855_v39 = vadd.f32 %v444_v36, %v224_v25  ;;  %836 = vmatprep.subr.bf16.mxu1 %v532_v33 }
 0x10b   :  { %v519_v40 = vadd.f32 %v854_v35, %v510_v37  ;;  %837 = vmatpush3.bf16.msra.mxu1 %v532_v33  ;;  %v526_v42 = vmax.f32 %v518_v34, 0.0 }
 0x10c   :  { %v517_v41 = vadd.f32 %v855_v39, %v500_v17  ;;  %838 = vmatprep.subr.bf16.mxu1 %v533_v29  ;;  %v524_v44 = vmax.f32 %v516_v38, 0.0 }
 0x10d   :  { %v527_v43 = vmax.f32 %v519_v40, 0.0 }
 0x10e   :  { %v525_v45 = vmax.f32 %v517_v41, 0.0 }
 0x10f   :  { %839 = vmatpush3.bf16.msra.mxu1 %v533_v29  ;;  %v535_v46 = vpack.c.bf16 %v527_v43, %v526_v42 }
 0x110   :  { %v534_v47 = vpack.c.bf16 %v525_v45, %v524_v44 }
 0x112   :  { %840 = vmatprep.subr.bf16.mxu1 %v534_v47 }
 0x113   :  { %841 = vmatpush3.bf16.msra.mxu1 %v534_v47 }
 0x114   :  { %842 = vmatprep.subr.bf16.mxu1 %v535_v46 }
 0x117   :  { %843 = vmatpush3.bf16.msra.mxu1 %v535_v46 }
 0x11a   :  { %845 = vmatmul.mubr.msk.bf16.vlgmr.msra.gmra.mrb[8].mxu1 %vm256_vm0, %v884_v48 }
 0x1ed   :  { %v846_v53 = vpop.f32.mrb[8].mxu1 }
 0x1ee   :  { %v610_v54 = vpop.f32.mrb[9].mxu1  ;;  %v619_v55 = vadd.f32 %v846_v53, %v553_v51 }
 0x1ef   :  { %v611_v56 = vadd.f32 %v610_v54, %v543_v49  ;;  %v847_v57 = vpop.f32.mrb[10].mxu1 }
 0x1f0   :  { %v613_v59 = vpop.f32.mrb[11].mxu1  ;;  %v622_v61 = vadd.f32 %v847_v57, %v558_v52  ;;  %v627_v0 = vmax.f32 %v619_v55, 0.0 }
 0x1f1   :  { %v625_v60 = vmax.f32 %v611_v56, 0.0  ;;  %v614_v62 = vadd.f32 %v613_v59, %v548_v50 }
 0x1f2   :  { %v628_v3 = vmax.f32 %v622_v61, 0.0  ;;  %v655_v7 = vmul.f32 %v646_v6, %v627_v0 }
 0x1f3   :  { %v626_v1 = vmax.f32 %v614_v62, 0.0  ;;  %v653_v2 = vmul.f32 %v636_v58, %v625_v60 }
 0x1f4   :  { %v656_v10 = vmul.f32 %v651_v9, %v628_v3 }
 0x1f5   :  { %v654_v4 = vmul.f32 %v641_v63, %v626_v1 }
 0x1f7   :  { %v657_v8 = vadd.f32 %v654_v4, %v653_v2 }
 0x1f9   :  { %v658_v11 = vadd.f32 %v657_v8, %v655_v7 }
 0x1fb   :  { %v659_v12 = vadd.f32 %v658_v11, %v656_v10 }
 0x1fd   :  { %v660_v13 = vrot.slane %v659_v12, 4 }
 0x1ff   :  { %v661_v14 = vadd.f32 %v660_v13, %v659_v12 }
 0x201   :  { %v662_v15 = vrot.slane %v661_v14, 2 }
 0x203   :  { %v663_v17 = vadd.f32 %v662_v15, %v661_v14 }
 0x205   :  { %v664_v19 = vrot.slane %v663_v17, 1 }
 0x207   :  { %v665_v21 = vadd.f32 %v664_v19, %v663_v17 }
 0x209   :  { %v676_v22 = vadd.f32 %v675_v20, %v665_v21 }
 0x20b   :  { %v754_v23 = vmul.f32 -1.442695, %v676_v22 }
 0x20d   :  { %885 = vpow2.f32 %v754_v23 }
 0x217   :  { %v886_v24 = vpop.eup %885 }
 0x218   :  { %v680_v25 = vadd.f32 1.0, %v886_v24 }
 0x21a   :  { %887 = vrcp.f32 %v680_v25 }
 0x224   :  { %v888_v26 = vpop.eup %887 }
 0x225   :  { %v683_v27 = vmul.f32 4.0, %v888_v26 }
 0x227   :  { %v684_v28 = vadd.f32 1.0, %v683_v27 }
 0x229   :  { %685 = vst [vmem:[#allocation3] sm:$0x1] %v684_v28 }
 0x22a   :  { %900 = shalt.err (!%p897_p4)
}
 0x22b   :  { %s901_s16 = scalar_lea.hbm %s1235_s11, 16 }
 0x22c   :  { %p902_p5 = scmp.ne.s32.totalorder %s1235_s11, %s901_s16  ;;  %p905_p6 = scmp.lt.u32.totalorder %s901_s16, %s1235_s11 }
 0x22e   :  { %p907_p7 = pnand %p905_p6, %p902_p5 }
 0x230   :  { %910 = shalt.err (!%p907_p7)
}
 0x231   :  { %695 = dma.vmem_to_hbm [thread:$0]  %s693_s12, 16, %s1235_s11, [#allocation4]  }
 0x232   :  { %911 = dma.done.wait [#allocation4], 16  }
 0x233   :  { %912 = vsyncadd [#allocation4], 4294967280 }
 0x234   :  { %699 = vsyncpa [#allocation4], 1 }

</bundles_post_ra>
